<compile_context>
chip_gen: v6e
topology: v6e:2x2x1
jax: 0.10.0
libtpu: 0.0.40
codegen_flags: <defaults>
</compile_context>

<pallas_src>
import functools

import jax
import jax.numpy as jnp
import numpy as np
from jax import lax
from jax.experimental import pallas as pl
from jax.experimental.pallas import tpu as pltpu

LANE = 128  # key/pos axis padded to a multiple of this (v5e-optimal; see TODO)


# ----------------------------- Pallas kernel ------------------------------ #

def _attn_kernel(q_ref, kt_ref, v_ref, pos_t_ref, o_ref, acc_ref, *,
                 heads, n, nk, d):
    """All heads of one batch element.

    q_ref:     (1, heads*n, d)   bfloat16   (already scaled by dim_head^-0.5)
    kt_ref:    (1, heads, d, nk) bfloat16   (keys transposed, zero-padded to nk)
    v_ref:     (1, heads, nk, d) bfloat16
    pos_t_ref: (d, nk)           bfloat16   (pos transposed, zero-padded to nk)
    o_ref:     (1, n, heads*d)   bfloat16   (head-merged output block)
    acc_ref:   (n, heads*d)      float32    VMEM scratch accumulator
    """
    q2d = q_ref[0]                                             # (heads*n, d) bf16
    pos_t = pos_t_ref[...]                                     # (d, nk)      bf16

    # Relative-position scores for ALL heads in one MXU pass (M = heads*n).
    t_all = jnp.dot(q2d, pos_t,
                    preferred_element_type=jnp.float32)        # (heads*n, nk)

    # Causal mask.  It also covers the zero-padded keys (col >= n > row) and
    # the wrap-around entries produced by the strided roll below.
    row = lax.broadcasted_iota(jnp.int32, (n, nk), 0)
    col = lax.broadcasted_iota(jnp.int32, (n, nk), 1)
    causal_masked = col > row

    # rel_shift as a strided roll: row i rotated by roll_shift + i, so
    # bias[i, j] = t[i, j + n - 1 - i] for j <= i; wrapped entries land only
    # where `causal_masked` is True.
    roll_shift = (nk - (n - 1)) % nk

    for h in range(heads):                                     # static & small
        qh = q2d[h * n:(h + 1) * n]                            # (n, d)   bf16
        kt = kt_ref[0, h]                                      # (d, nk)  bf16
        vh = v_ref[0, h]                                       # (nk, d)  bf16

        # content scores (MXU, f32 accumulation); K^T layout -> no transpose
        dots = jnp.dot(qh, kt,
                       preferred_element_type=jnp.float32)     # (n, nk)

        # this head's rows of the batched position-score tile + one XLU roll
        t_h = t_all[h * n:(h + 1) * n]                         # (n, nk) f32
        bias = pltpu.roll(t_h, roll_shift, axis=1, stride=1, stride_axis=0)

        s = jnp.where(causal_masked, -jnp.inf, dots + bias)    # (n, nk) f32

        # softmax statistics in f32
        m = jnp.max(s, axis=-1, keepdims=True)
        e = jnp.exp(s - m)
        l = jnp.sum(e, axis=-1, keepdims=True)

        # attn @ v first; normalize the small (n, d) result with an EUP
        # approximate reciprocal.
        out_h = jnp.dot(e.astype(jnp.bfloat16), vh,
                        preferred_element_type=jnp.float32)    # (n, d)
        out_h = out_h * pl.reciprocal(l, approx=True)

        # Static-slice store into the head-merged accumulator (plain vst;
        # replaces the old one-hot placement matmul).
        acc_ref[:, h * d:(h + 1) * d] = out_h

    # One store of the merged (n, heads*d) slab.  (Lane-dense for production
    # dim >= 128; at the toy dim=32 this is a small masked store.)
    o_ref[0] = acc_ref[...].astype(o_ref.dtype)


def attention_core(q_flat, kt_heads, v_heads, pos_t, *, heads, n, d):
    """q_flat: (b, heads*n, d) bf16 (pre-scaled); kt_heads: (b, heads, d, nk)
    bf16; v_heads: (b, heads, nk, d) bf16; pos_t: (d, nk) bf16."""
    b = q_flat.shape[0]
    nk = kt_heads.shape[3]
    dim = heads * d
    kernel = functools.partial(_attn_kernel, heads=heads, n=n, nk=nk, d=d)
    return pl.pallas_call(
        kernel,
        out_shape=jax.ShapeDtypeStruct((b, n, dim), jnp.bfloat16),
        grid=(b,),
        in_specs=[
            pl.BlockSpec((1, heads * n, d), lambda i: (i, 0, 0)),
            pl.BlockSpec((1, heads, d, nk), lambda i: (i, 0, 0, 0)),
            pl.BlockSpec((1, heads, nk, d), lambda i: (i, 0, 0, 0)),
            pl.BlockSpec((d, nk), lambda i: (0, 0)),
        ],
        out_specs=pl.BlockSpec((1, n, dim), lambda i: (i, 0, 0)),
        scratch_shapes=[pltpu.VMEM((n, dim), jnp.float32)],
        compiler_params=pltpu.CompilerParams(
            dimension_semantics=("parallel",),
            vmem_limit_bytes=32 * 1024 * 1024),
    )(q_flat, kt_heads, v_heads, pos_t)


# ------------------------------ module glue -------------------------------- #

def init_params(key, dim, heads):
    dim_head = dim // heads
    ks = jax.random.split(key, 8)
    s = 0.02
    return {
        "w_pos": jax.random.normal(ks[0], (dim_head, dim), jnp.float32) * s,
        "b_pos": jax.random.normal(ks[1], (dim_head,), jnp.float32) * s,
        "w_q": jax.random.normal(ks[2], (dim, dim), jnp.float32) * s,
        "b_q": jax.random.normal(ks[3], (dim,), jnp.float32) * s,
        "w_kv": jax.random.normal(ks[4], (2 * dim, dim), jnp.float32) * s,
        "b_kv": jax.random.normal(ks[5], (2 * dim,), jnp.float32) * s,
        "w_out": jax.random.normal(ks[6], (dim, dim), jnp.float32) * s,
        "b_out": jax.random.normal(ks[7], (dim,), jnp.float32) * s,
    }


def split_heads(t, h):
    # 'b n (h d) -> b h n d'
    b, n, hd = t.shape
    return t.reshape(b, n, h, hd // h).transpose(0, 2, 1, 3)


def causal_attention_forward(params, x, pos_emb, heads):
    """x: (b, n, dim), pos_emb: (n, dim).  mem=None, expire_mask=None."""
    b, n, dim = x.shape
    d = dim // heads
    scale = d ** -0.5
    nk = ((n + LANE - 1) // LANE) * LANE       # lane-aligned key/pos axis

    # Softmax scale folded into q right after the projection (applies to both
    # the content and position scores inside the kernel); XLA fuses the mul.
    q = (x @ params["w_q"].T + params["b_q"]) * scale           # (b, n, dim)
    kv = x @ params["w_kv"].T + params["b_kv"]                  # (b, n, 2*dim)
    k, v = jnp.split(kv, 2, axis=-1)
    pos = pos_emb @ params["w_pos"].T + params["b_pos"]         # (n, d)

    qh = split_heads(q, heads).astype(jnp.bfloat16)             # (b, h, n, d)
    kh = split_heads(k, heads).astype(jnp.bfloat16)
    vh = split_heads(v, heads).astype(jnp.bfloat16)

    # Zero-pad the key/pos axis to a multiple of 128 so the (n, nk) score and
    # bias tiles (and the strided roll) are lane-aligned; padded keys fall
    # under the causal mask inside the kernel.
    pad = nk - n
    kh = jnp.pad(kh, ((0, 0), (0, 0), (0, pad), (0, 0)))
    vh = jnp.pad(vh, ((0, 0), (0, 0), (0, pad), (0, 0)))

    q_flat = qh.reshape(b, heads * n, d)                        # merged-heads q
    kt = kh.transpose(0, 1, 3, 2)                               # (b, h, d, nk)
    pos_t = jnp.pad(pos, ((0, pad), (0, 0))).T.astype(jnp.bfloat16)  # (d, nk)

    out = attention_core(q_flat, kt, vh, pos_t,
                         heads=heads, n=n, d=d)                 # (b, n, dim) bf16
    return out @ params["w_out"].T + params["b_out"]


# --------------------------- pure-JAX reference ----------------------------- #

def _rel_shift_ref(t):
    b, h, i, j = t.shape
    zero_pad = jnp.zeros((b, h, i, 1), t.dtype)
    cat = jnp.concatenate([zero_pad, t], axis=-1)
    shifted = cat.reshape(b, h, j + 1, i)[:, :, 1:]
    return shifted.reshape(b, h, i, j)


def reference_forward(params, x, pos_emb, heads):
    b, n, dim = x.shape
    dim_head = dim // heads
    scale = dim_head ** -0.5
    q = x @ params["w_q"].T + params["b_q"]
    kv = x @ params["w_kv"].T + params["b_kv"]
    k, v = jnp.split(kv, 2, axis=-1)
    q, k, v = (split_heads(t, heads) for t in (q, k, v))
    dots = jnp.einsum("bhid,bhjd->bhij", q, k) * scale
    pos = pos_emb @ params["w_pos"].T + params["b_pos"]
    pos_dots = jnp.einsum("bhid,jd->bhij", q, pos) * scale
    pos_dots = _rel_shift_ref(pos_dots)
    dots = dots + pos_dots
    mask = jnp.triu(jnp.ones((n, n), bool), 1)[None, None]
    dots = jnp.where(mask, -jnp.inf, dots)
    attn = jax.nn.softmax(dots, axis=-1)
    out = jnp.einsum("bhij,bhjd->bhid", attn, v)
    out = out.transpose(0, 2, 1, 3).reshape(b, n, dim)
    return out @ params["w_out"].T + params["b_out"]


# ----------------------------------- main ----------------------------------- #

if __name__ == "__main__":
    batch, seq, dim, heads = 2, 8, 32, 4

    key = jax.random.PRNGKey(0)
    k_param, k_x, k_pos = jax.random.split(key, 3)
    params = init_params(k_param, dim, heads)
    x = jax.random.normal(k_x, (batch, seq, dim), jnp.float32)
    pos_emb = jax.random.normal(k_pos, (seq, dim), jnp.float32)

    out = causal_attention_forward(params, x, pos_emb, heads)
    out = jax.block_until_ready(out)

    ref = jax.block_until_ready(reference_forward(params, x, pos_emb, heads))
    # bf16 q/k/v/probs/output on the MXU path + approx reciprocal -> loosened
    # (but still meaningful) tolerances vs the f32 reference.
    np.testing.assert_allclose(np.asarray(out), np.asarray(ref),
                               rtol=3e-2, atol=3e-3)

    print("KERNEL_OK")
</pallas_src>

<mosaic_0001>
module attributes {stable_mosaic.version = 11 : i64} {
  func.func @_attn_kernel(%arg0: i32, %arg1: memref<1x32x8xbf16, #tpu.memory_space<vmem>>, %arg2: memref<1x4x8x128xbf16, #tpu.memory_space<vmem>>, %arg3: memref<1x4x128x8xbf16, #tpu.memory_space<vmem>>, %arg4: memref<8x128xbf16, #tpu.memory_space<vmem>>, %arg5: memref<1x8x32xbf16, #tpu.memory_space<vmem>>, %arg6: memref<8x32xf32, #tpu.memory_space<vmem>>) attributes {dimension_semantics = [#tpu.dimension_semantics<parallel>], iteration_bounds = array<i64: 2>, scalar_prefetch = 0 : i64, scratch_operands = 1 : i64, tpu.core_type = #tpu.core_type<tc>, window_params = [{transform_indices = @transform_0, window_bounds = array<i64: 1, 32, 8>}, {transform_indices = @transform_1, window_bounds = array<i64: 1, 4, 8, 128>}, {transform_indices = @transform_2, window_bounds = array<i64: 1, 4, 128, 8>}, {pipeline_mode = #tpu.pipeline_mode<synchronous>, transform_indices = @transform_3, window_bounds = array<i64: 8, 128>}, {transform_indices = @transform_4, window_bounds = array<i64: 1, 8, 32>}]} {
    %c0 = arith.constant 0 : index
    %c0_0 = arith.constant 0 : index
    %c0_1 = arith.constant 0 : index
    %0 = vector.load %arg1[%c0, %c0_0, %c0_1] : memref<1x32x8xbf16, #tpu.memory_space<vmem>>, vector<1x32x8xbf16>
    %1 = vector.shape_cast %0 : vector<1x32x8xbf16> to vector<32x8xbf16>
    %c0_2 = arith.constant 0 : index
    %c0_3 = arith.constant 0 : index
    %2 = vector.load %arg4[%c0_2, %c0_3] : memref<8x128xbf16, #tpu.memory_space<vmem>>, vector<8x128xbf16>
    %cst = arith.constant dense<0.000000e+00> : vector<32x128xf32>
    %3 = tpu.matmul %1, %2, %cst {dimension_numbers = #tpu.dot_dimension_numbers<[1], [0], [0], [1], [0, 0, 1, 1], [], []>} : vector<32x8xbf16>, vector<8x128xbf16>, vector<32x128xf32> -> vector<32x128xf32>
    %4 = tpu.iota {dimensions = array<i32: 0>} : vector<8x128xi32>
    %5 = tpu.iota {dimensions = array<i32: 1>} : vector<8x128xi32>
    %6 = arith.cmpi sgt, %5, %4 : vector<8x128xi32>
    %7 = vector.extract_strided_slice %1 {offsets = [0, 0], sizes = [8, 8], strides = [1, 1]} : vector<32x8xbf16> to vector<8x8xbf16>
    %c0_4 = arith.constant 0 : index
    %c0_5 = arith.constant 0 : index
    %c0_6 = arith.constant 0 : index
    %c0_7 = arith.constant 0 : index
    %8 = vector.load %arg2[%c0_4, %c0_5, %c0_6, %c0_7] : memref<1x4x8x128xbf16, #tpu.memory_space<vmem>>, vector<1x1x8x128xbf16>
    %9 = vector.shape_cast %8 : vector<1x1x8x128xbf16> to vector<8x128xbf16>
    %c0_8 = arith.constant 0 : index
    %c0_9 = arith.constant 0 : index
    %c0_10 = arith.constant 0 : index
    %c0_11 = arith.constant 0 : index
    %10 = vector.load %arg3[%c0_8, %c0_9, %c0_10, %c0_11] : memref<1x4x128x8xbf16, #tpu.memory_space<vmem>>, vector<1x1x128x8xbf16>
    %11 = vector.shape_cast %10 : vector<1x1x128x8xbf16> to vector<128x8xbf16>
    %cst_12 = arith.constant dense<0.000000e+00> : vector<8x128xf32>
    %12 = tpu.matmul %7, %9, %cst_12 {dimension_numbers = #tpu.dot_dimension_numbers<[1], [0], [0], [1], [0, 0, 1, 1], [], []>} : vector<8x8xbf16>, vector<8x128xbf16>, vector<8x128xf32> -> vector<8x128xf32>
    %13 = vector.extract_strided_slice %3 {offsets = [0, 0], sizes = [8, 128], strides = [1, 1]} : vector<32x128xf32> to vector<8x128xf32>
    %c121_i32 = arith.constant 121 : i32
    %14 = tpu.dynamic_rotate %13 by %c121_i32 dim 1 {stride = 1 : si32, stride_dimension = 0 : si32} : vector<8x128xf32>, i32 -> vector<8x128xf32>
    %15 = arith.addf %12, %14 : vector<8x128xf32>
    %cst_13 = arith.constant 0xFF800000 : f32
    %16 = vector.broadcast %cst_13 : f32 to vector<8x128xf32>
    %17 = arith.select %6, %16, %15 : vector<8x128xi1>, vector<8x128xf32>
    %cst_14 = arith.constant dense<0xFF800000> : vector<8xf32>
    %18 = vector.multi_reduction <maximumf>, %17, %cst_14 [1] : vector<8x128xf32> to vector<8xf32>
    %19 = vector.shape_cast %18 : vector<8xf32> to vector<8x1xf32>
    %20 = vector.broadcast %19 : vector<8x1xf32> to vector<8x128xf32>
    %21 = arith.subf %17, %20 : vector<8x128xf32>
    %22 = math.exp %21 : vector<8x128xf32>
    %cst_15 = arith.constant dense<0.000000e+00> : vector<8xf32>
    %23 = vector.multi_reduction <add>, %22, %cst_15 [1] : vector<8x128xf32> to vector<8xf32>
    %24 = vector.shape_cast %23 : vector<8xf32> to vector<8x1xf32>
    %25 = arith.truncf %22 : vector<8x128xf32> to vector<8x128xbf16>
    %cst_16 = arith.constant dense<0.000000e+00> : vector<8x8xf32>
    %26 = tpu.matmul %25, %11, %cst_16 {dimension_numbers = #tpu.dot_dimension_numbers<[1], [0], [0], [1], [0, 0, 1, 1], [], []>} : vector<8x128xbf16>, vector<128x8xbf16>, vector<8x8xf32> -> vector<8x8xf32>
    %27 = tpu.reciprocal %24 {approx = true} : vector<8x1xf32> -> vector<8x1xf32>
    %28 = vector.broadcast %27 : vector<8x1xf32> to vector<8x8xf32>
    %29 = arith.mulf %26, %28 : vector<8x8xf32>
    %c0_17 = arith.constant 0 : index
    %c0_18 = arith.constant 0 : index
    %30 = vector.load %arg6[%c0_17, %c0_18] : memref<8x32xf32, #tpu.memory_space<vmem>>, vector<8x8xf32>
    tpu.vector_store %arg6[%c0_17, %c0_18], %29 {strides = array<i32>} : memref<8x32xf32, #tpu.memory_space<vmem>>, vector<8x8xf32>,
    %31 = vector.extract_strided_slice %1 {offsets = [8, 0], sizes = [8, 8], strides = [1, 1]} : vector<32x8xbf16> to vector<8x8xbf16>
    %c0_19 = arith.constant 0 : index
    %c1 = arith.constant 1 : index
    %c0_20 = arith.constant 0 : index
    %c0_21 = arith.constant 0 : index
    %32 = vector.load %arg2[%c0_19, %c1, %c0_20, %c0_21] : memref<1x4x8x128xbf16, #tpu.memory_space<vmem>>, vector<1x1x8x128xbf16>
    %33 = vector.shape_cast %32 : vector<1x1x8x128xbf16> to vector<8x128xbf16>
    %c0_22 = arith.constant 0 : index
    %c1_23 = arith.constant 1 : index
    %c0_24 = arith.constant 0 : index
    %c0_25 = arith.constant 0 : index
    %34 = vector.load %arg3[%c0_22, %c1_23, %c0_24, %c0_25] : memref<1x4x128x8xbf16, #tpu.memory_space<vmem>>, vector<1x1x128x8xbf16>
    %35 = vector.shape_cast %34 : vector<1x1x128x8xbf16> to vector<128x8xbf16>
    %cst_26 = arith.constant dense<0.000000e+00> : vector<8x128xf32>
    %36 = tpu.matmul %31, %33, %cst_26 {dimension_numbers = #tpu.dot_dimension_numbers<[1], [0], [0], [1], [0, 0, 1, 1], [], []>} : vector<8x8xbf16>, vector<8x128xbf16>, vector<8x128xf32> -> vector<8x128xf32>
    %37 = vector.extract_strided_slice %3 {offsets = [8, 0], sizes = [8, 128], strides = [1, 1]} : vector<32x128xf32> to vector<8x128xf32>
    %c121_i32_27 = arith.constant 121 : i32
    %38 = tpu.dynamic_rotate %37 by %c121_i32_27 dim 1 {stride = 1 : si32, stride_dimension = 0 : si32} : vector<8x128xf32>, i32 -> vector<8x128xf32>
    %39 = arith.addf %36, %38 : vector<8x128xf32>
    %cst_28 = arith.constant 0xFF800000 : f32
    %40 = vector.broadcast %cst_28 : f32 to vector<8x128xf32>
    %41 = arith.select %6, %40, %39 : vector<8x128xi1>, vector<8x128xf32>
    %cst_29 = arith.constant dense<0xFF800000> : vector<8xf32>
    %42 = vector.multi_reduction <maximumf>, %41, %cst_29 [1] : vector<8x128xf32> to vector<8xf32>
    %43 = vector.shape_cast %42 : vector<8xf32> to vector<8x1xf32>
    %44 = vector.broadcast %43 : vector<8x1xf32> to vector<8x128xf32>
    %45 = arith.subf %41, %44 : vector<8x128xf32>
    %46 = math.exp %45 : vector<8x128xf32>
    %cst_30 = arith.constant dense<0.000000e+00> : vector<8xf32>
    %47 = vector.multi_reduction <add>, %46, %cst_30 [1] : vector<8x128xf32> to vector<8xf32>
    %48 = vector.shape_cast %47 : vector<8xf32> to vector<8x1xf32>
    %49 = arith.truncf %46 : vector<8x128xf32> to vector<8x128xbf16>
    %cst_31 = arith.constant dense<0.000000e+00> : vector<8x8xf32>
    %50 = tpu.matmul %49, %35, %cst_31 {dimension_numbers = #tpu.dot_dimension_numbers<[1], [0], [0], [1], [0, 0, 1, 1], [], []>} : vector<8x128xbf16>, vector<128x8xbf16>, vector<8x8xf32> -> vector<8x8xf32>
    %51 = tpu.reciprocal %48 {approx = true} : vector<8x1xf32> -> vector<8x1xf32>
    %52 = vector.broadcast %51 : vector<8x1xf32> to vector<8x8xf32>
    %53 = arith.mulf %50, %52 : vector<8x8xf32>
    %c0_32 = arith.constant 0 : index
    %c8 = arith.constant 8 : index
    %54 = vector.load %arg6[%c0_32, %c8] : memref<8x32xf32, #tpu.memory_space<vmem>>, vector<8x8xf32>
    tpu.vector_store %arg6[%c0_32, %c8], %53 {strides = array<i32>} : memref<8x32xf32, #tpu.memory_space<vmem>>, vector<8x8xf32>,
    %55 = vector.extract_strided_slice %1 {offsets = [16, 0], sizes = [8, 8], strides = [1, 1]} : vector<32x8xbf16> to vector<8x8xbf16>
    %c0_33 = arith.constant 0 : index
    %c2 = arith.constant 2 : index
    %c0_34 = arith.constant 0 : index
    %c0_35 = arith.constant 0 : index
    %56 = vector.load %arg2[%c0_33, %c2, %c0_34, %c0_35] : memref<1x4x8x128xbf16, #tpu.memory_space<vmem>>, vector<1x1x8x128xbf16>
    %57 = vector.shape_cast %56 : vector<1x1x8x128xbf16> to vector<8x128xbf16>
    %c0_36 = arith.constant 0 : index
    %c2_37 = arith.constant 2 : index
    %c0_38 = arith.constant 0 : index
    %c0_39 = arith.constant 0 : index
    %58 = vector.load %arg3[%c0_36, %c2_37, %c0_38, %c0_39] : memref<1x4x128x8xbf16, #tpu.memory_space<vmem>>, vector<1x1x128x8xbf16>
    %59 = vector.shape_cast %58 : vector<1x1x128x8xbf16> to vector<128x8xbf16>
    %cst_40 = arith.constant dense<0.000000e+00> : vector<8x128xf32>
    %60 = tpu.matmul %55, %57, %cst_40 {dimension_numbers = #tpu.dot_dimension_numbers<[1], [0], [0], [1], [0, 0, 1, 1], [], []>} : vector<8x8xbf16>, vector<8x128xbf16>, vector<8x128xf32> -> vector<8x128xf32>
    %61 = vector.extract_strided_slice %3 {offsets = [16, 0], sizes = [8, 128], strides = [1, 1]} : vector<32x128xf32> to vector<8x128xf32>
    %c121_i32_41 = arith.constant 121 : i32
    %62 = tpu.dynamic_rotate %61 by %c121_i32_41 dim 1 {stride = 1 : si32, stride_dimension = 0 : si32} : vector<8x128xf32>, i32 -> vector<8x128xf32>
    %63 = arith.addf %60, %62 : vector<8x128xf32>
    %cst_42 = arith.constant 0xFF800000 : f32
    %64 = vector.broadcast %cst_42 : f32 to vector<8x128xf32>
    %65 = arith.select %6, %64, %63 : vector<8x128xi1>, vector<8x128xf32>
    %cst_43 = arith.constant dense<0xFF800000> : vector<8xf32>
    %66 = vector.multi_reduction <maximumf>, %65, %cst_43 [1] : vector<8x128xf32> to vector<8xf32>
    %67 = vector.shape_cast %66 : vector<8xf32> to vector<8x1xf32>
    %68 = vector.broadcast %67 : vector<8x1xf32> to vector<8x128xf32>
    %69 = arith.subf %65, %68 : vector<8x128xf32>
    %70 = math.exp %69 : vector<8x128xf32>
    %cst_44 = arith.constant dense<0.000000e+00> : vector<8xf32>
    %71 = vector.multi_reduction <add>, %70, %cst_44 [1] : vector<8x128xf32> to vector<8xf32>
    %72 = vector.shape_cast %71 : vector<8xf32> to vector<8x1xf32>
    %73 = arith.truncf %70 : vector<8x128xf32> to vector<8x128xbf16>
    %cst_45 = arith.constant dense<0.000000e+00> : vector<8x8xf32>
    %74 = tpu.matmul %73, %59, %cst_45 {dimension_numbers = #tpu.dot_dimension_numbers<[1], [0], [0], [1], [0, 0, 1, 1], [], []>} : vector<8x128xbf16>, vector<128x8xbf16>, vector<8x8xf32> -> vector<8x8xf32>
    %75 = tpu.reciprocal %72 {approx = true} : vector<8x1xf32> -> vector<8x1xf32>
    %76 = vector.broadcast %75 : vector<8x1xf32> to vector<8x8xf32>
    %77 = arith.mulf %74, %76 : vector<8x8xf32>
    %c0_46 = arith.constant 0 : index
    %c16 = arith.constant 16 : index
    %78 = vector.load %arg6[%c0_46, %c16] : memref<8x32xf32, #tpu.memory_space<vmem>>, vector<8x8xf32>
    tpu.vector_store %arg6[%c0_46, %c16], %77 {strides = array<i32>} : memref<8x32xf32, #tpu.memory_space<vmem>>, vector<8x8xf32>,
    %79 = vector.extract_strided_slice %1 {offsets = [24, 0], sizes = [8, 8], strides = [1, 1]} : vector<32x8xbf16> to vector<8x8xbf16>
    %c0_47 = arith.constant 0 : index
    %c3 = arith.constant 3 : index
    %c0_48 = arith.constant 0 : index
    %c0_49 = arith.constant 0 : index
    %80 = vector.load %arg2[%c0_47, %c3, %c0_48, %c0_49] : memref<1x4x8x128xbf16, #tpu.memory_space<vmem>>, vector<1x1x8x128xbf16>
    %81 = vector.shape_cast %80 : vector<1x1x8x128xbf16> to vector<8x128xbf16>
    %c0_50 = arith.constant 0 : index
    %c3_51 = arith.constant 3 : index
    %c0_52 = arith.constant 0 : index
    %c0_53 = arith.constant 0 : index
    %82 = vector.load %arg3[%c0_50, %c3_51, %c0_52, %c0_53] : memref<1x4x128x8xbf16, #tpu.memory_space<vmem>>, vector<1x1x128x8xbf16>
    %83 = vector.shape_cast %82 : vector<1x1x128x8xbf16> to vector<128x8xbf16>
    %cst_54 = arith.constant dense<0.000000e+00> : vector<8x128xf32>
    %84 = tpu.matmul %79, %81, %cst_54 {dimension_numbers = #tpu.dot_dimension_numbers<[1], [0], [0], [1], [0, 0, 1, 1], [], []>} : vector<8x8xbf16>, vector<8x128xbf16>, vector<8x128xf32> -> vector<8x128xf32>
    %85 = vector.extract_strided_slice %3 {offsets = [24, 0], sizes = [8, 128], strides = [1, 1]} : vector<32x128xf32> to vector<8x128xf32>
    %c121_i32_55 = arith.constant 121 : i32
    %86 = tpu.dynamic_rotate %85 by %c121_i32_55 dim 1 {stride = 1 : si32, stride_dimension = 0 : si32} : vector<8x128xf32>, i32 -> vector<8x128xf32>
    %87 = arith.addf %84, %86 : vector<8x128xf32>
    %cst_56 = arith.constant 0xFF800000 : f32
    %88 = vector.broadcast %cst_56 : f32 to vector<8x128xf32>
    %89 = arith.select %6, %88, %87 : vector<8x128xi1>, vector<8x128xf32>
    %cst_57 = arith.constant dense<0xFF800000> : vector<8xf32>
    %90 = vector.multi_reduction <maximumf>, %89, %cst_57 [1] : vector<8x128xf32> to vector<8xf32>
    %91 = vector.shape_cast %90 : vector<8xf32> to vector<8x1xf32>
    %92 = vector.broadcast %91 : vector<8x1xf32> to vector<8x128xf32>
    %93 = arith.subf %89, %92 : vector<8x128xf32>
    %94 = math.exp %93 : vector<8x128xf32>
    %cst_58 = arith.constant dense<0.000000e+00> : vector<8xf32>
    %95 = vector.multi_reduction <add>, %94, %cst_58 [1] : vector<8x128xf32> to vector<8xf32>
    %96 = vector.shape_cast %95 : vector<8xf32> to vector<8x1xf32>
    %97 = arith.truncf %94 : vector<8x128xf32> to vector<8x128xbf16>
    %cst_59 = arith.constant dense<0.000000e+00> : vector<8x8xf32>
    %98 = tpu.matmul %97, %83, %cst_59 {dimension_numbers = #tpu.dot_dimension_numbers<[1], [0], [0], [1], [0, 0, 1, 1], [], []>} : vector<8x128xbf16>, vector<128x8xbf16>, vector<8x8xf32> -> vector<8x8xf32>
    %99 = tpu.reciprocal %96 {approx = true} : vector<8x1xf32> -> vector<8x1xf32>
    %100 = vector.broadcast %99 : vector<8x1xf32> to vector<8x8xf32>
    %101 = arith.mulf %98, %100 : vector<8x8xf32>
    %c0_60 = arith.constant 0 : index
    %c24 = arith.constant 24 : index
    %102 = vector.load %arg6[%c0_60, %c24] : memref<8x32xf32, #tpu.memory_space<vmem>>, vector<8x8xf32>
    tpu.vector_store %arg6[%c0_60, %c24], %101 {strides = array<i32>} : memref<8x32xf32, #tpu.memory_space<vmem>>, vector<8x8xf32>,
    %c0_61 = arith.constant 0 : index
    %c0_62 = arith.constant 0 : index
    %103 = vector.load %arg6[%c0_61, %c0_62] : memref<8x32xf32, #tpu.memory_space<vmem>>, vector<8x32xf32>
    %104 = arith.truncf %103 : vector<8x32xf32> to vector<8x32xbf16>
    %c0_63 = arith.constant 0 : index
    %c0_64 = arith.constant 0 : index
    %c0_65 = arith.constant 0 : index
    %105 = vector.load %arg5[%c0_63, %c0_64, %c0_65] : memref<1x8x32xbf16, #tpu.memory_space<vmem>>, vector<1x8x32xbf16>
    %106 = vector.shape_cast %105 : vector<1x8x32xbf16> to vector<8x32xbf16>
    %107 = vector.shape_cast %104 : vector<8x32xbf16> to vector<1x8x32xbf16>
    tpu.vector_store %arg5[%c0_63, %c0_64, %c0_65], %107 {strides = array<i32>} : memref<1x8x32xbf16, #tpu.memory_space<vmem>>, vector<1x8x32xbf16>,
    return
  }
  func.func @transform_0(%arg0: i32) -> (i32, i32, i32) {
    %c0_i32 = arith.constant 0 : i32
    %c0_i32_0 = arith.constant 0 : i32
    %c0_i32_1 = arith.constant 0 : i32
    return %arg0, %c0_i32, %c0_i32_0 : i32, i32, i32
  }
  func.func @transform_1(%arg0: i32) -> (i32, i32, i32, i32) {
    %c0_i32 = arith.constant 0 : i32
    %c0_i32_0 = arith.constant 0 : i32
    %c0_i32_1 = arith.constant 0 : i32
    %c0_i32_2 = arith.constant 0 : i32
    return %arg0, %c0_i32, %c0_i32_0, %c0_i32_1 : i32, i32, i32, i32
  }
  func.func @transform_2(%arg0: i32) -> (i32, i32, i32, i32) {
    %c0_i32 = arith.constant 0 : i32
    %c0_i32_0 = arith.constant 0 : i32
    %c0_i32_1 = arith.constant 0 : i32
    %c0_i32_2 = arith.constant 0 : i32
    return %arg0, %c0_i32, %c0_i32_0, %c0_i32_1 : i32, i32, i32, i32
  }
  func.func @transform_3(%arg0: i32) -> (i32, i32) {
    %c0_i32 = arith.constant 0 : i32
    %c0_i32_0 = arith.constant 0 : i32
    %c0_i32_1 = arith.constant 0 : i32
    return %c0_i32, %c0_i32_0 : i32, i32
  }
  func.func @transform_4(%arg0: i32) -> (i32, i32, i32) {
    %c0_i32 = arith.constant 0 : i32
    %c0_i32_0 = arith.constant 0 : i32
    %c0_i32_1 = arith.constant 0 : i32
    return %arg0, %c0_i32, %c0_i32_0 : i32, i32, i32
  }
}

</mosaic_0001>

<bundles_post_ra>
// kernel: tpu_custom_call.1
= control target key start
LH: loop header
LB: loop body
LE: loop exit
PB: predicated region body
PF: predicated region fallthrough
CT: control target
= control target key end

     0   :  { %9 = vsyncpa [#allocation4], 0  ;;  %s1805_s0 = inlined_call_operand.vmem [shape: bf16[2,32,8], index: 0, kind: input, shape index: {}]   ;;  %s1806_s1 = inlined_call_operand.vmem [shape: bf16[2,4,8,128], index: 1, kind: input, shape index: {}]   ;;  %s1807_s2 = inlined_call_operand.vmem [shape: bf16[2,4,128,8], index: 2, kind: input, shape index: {}]   ;;  %s1808_s3 = inlined_call_operand.vmem [shape: bf16[8,128], index: 3, kind: input, shape index: {}]   ;;  %s1809_s4 = inlined_call_operand.hbm [shape: bf16[2,8,32], index: 4, kind: output, shape index: {}]  }
   0x1   :  { %11 = vsyncpa [#allocation4 + $0x1], 0  ;;  %s1563_s15 = smov 0   ;;  %s1565_s16 = smov 0  }
   0x2   :  { %s1567_s17 = smov 0   ;;  %s1569_s18 = smov 0  }
   0x3 LB: > { %s1584_s19 = sadd.s32 4294967295, %s1529_s18   ;;  %s1107_s20 = sadd.s32 4294967294, %s1529_s18   ;;  %s1529_s18 = sphi %s1569_s18, %s1815_s18   ;;  %s1525_s17 = sphi %s1567_s17, %s1814_s17   ;;  %s1521_s16 = sphi %s1565_s16, %s1813_s16   ;;  %s1517_s15 = sphi %s1563_s15, %s1812_s15  }
   0x4   : > { %s1588_s21 = sadd.s32 1, %s1529_s18   ;;  %s123_s22 = sadd.s32 1, %s1525_s17 }
   0x5   : > { %s120_s23 = ssub.s32 %s1529_s18, %s1588_s21  ;;  %p133_p0 = scmp.ne.s32.totalorder %s1525_s17, %s1521_s16 }
   0x6   : > { %p121_p1 = scmp.eq.s32.totalorder %s120_s23, 0  ;;  %p134_p2 = scmp.eq.s32.totalorder %s1584_s19, 1 }
   0x7   : > { %p139_p3 = scmp.ne.s32.totalorder %s1521_s16, %s1517_s15  ;;  %p140_p4 = scmp.eq.s32.totalorder %s1107_s20, 1 }
   0x8   : > { %s1599_s24 = scalar_select %p121_p1, %s1525_s17, %s123_s22  }
   0x9   : > { %p1601_p5 = por %p134_p2, %p133_p0  ;;  %p1605_p6 = por %p140_p4, %p139_p3 }
   0xa   : > { %p1110_p7 = scmp.ge.s32.totalorder %s1529_s18, 1  ;;  %p185_p8 = scmp.lt.s32.totalorder %s1529_s18, 3 }
   0xc   : > { %p186_p9 = pnand %p1110_p7, %p185_p8 }
   0xd   : > { %p221_p10 = scmp.lt.s32.totalorder (!%p186_p9), %s1584_s19, 1  ;;  %s1533_s20 = smov (!%p186_p9), 377  }
   0xe   : > { %189 = sbr.rel (%p186_p9) target bundleno = 1197 (0x4ad), region = 36  ;;  %s1534_s22 = smov (!%p186_p9), 8  }
   0xf   : > { %s1535_s23 = smov (!%p186_p9), 16   ;;  %s1536_s27 = smov (!%p186_p9), 24  }
  0x10   : > { %s218_s28 = sand.u32 (!%p186_p9), 1, %s1521_s16   ;;  %s1537_s12 = smov (!%p186_p9), [#allocation3]  }
  0x11   : > { %s1011_s10 = scalar_lea.sflag (!%p186_p9), [#allocation4], %s218_s28  ;;  %s1473_s13 = sshll.u32 (!%p186_p9), %s1537_s12, 4  ;;  %s1474_s13 = int_to_ptr.vmem [resolvable:$false] %s1473_s13 }
  0x13   : > { %v241_v0 = vld [vmem:[%s1808_s3] sm:$0xf]  ;;  %vm259_vm0 = vcmask 1043456   ;;  %v1531_v2 = vmov 0.0   ;;  %s222_s29 = scalar_select %p221_p10, %s1584_s19, 1  ;;  %vm1532_vm1 = vmmov 0   ;;  %v312_v30 = vlaneseq }
  0x14   : > { %1373 = vmatprep.subr.msk.bf16.mxu0 %vm259_vm0, %v241_v0  ;;  %v261_v1 = vsel %vm259_vm0, %v241_v0, 0  ;;  %1269 = vmatprep.subr.bf16.mxu1 %v1531_v2  ;;  %vm252_vm2 = vcmask 64512   ;;  %vm656_vm4 = vcmask 130112   ;;  %vm830_vm5 = vcmask 195712  }
  0x15   : > { %1264 = vmatpush3.bf16.msra.mxu0 %v261_v1  ;;  %1271 = vmatprep.mubr.msk.bf16.mxu1 %vm1532_vm1, %v1531_v2  ;;  %s1213_s30 = sshll.u32 %s222_s29, 4  ;;  %s1215_s5 = sshll.u32 %s222_s29, 8  ;;  %v1670_v31 = vshrl.u32 %v312_v30, 7  ;;  %v1672_v32 = vand.u32 127, %v312_v30  ;;  %vm1004_vm6 = vcmask 261312   ;;  %vm1008_vm7 = vcmask 257024  }
  0x16   : > { %1275 = vmatprep.subr.bf16.mxu0 %v1531_v2  ;;  %s225_s8 = scalar_lea.vmem %s1805_s0, %s1213_s30  ;;  %s1630_s11 = scalar_lea.vmem %s1806_s1, %s1213_s30 }
  0x17   : > { %v237_v3 = vld [vmem:[%s225_s8] sm:$0xf]  ;;  %v238_v4 = vld [vmem:[%s225_s8 + $0x4] sm:$0xf]  ;;  %v1625_v5 = vld [vmem:[%s225_s8 + $0x8] sm:$0xf]  ;;  %s1635_s14 = scalar_lea.vmem %s1807_s2, %s1215_s5  ;;  %vm316_vm3 = vcmp.gt.s32.totalorder %v1672_v32, %v1670_v31 }
  0x18   : > { %v1118_v6 = vcombine.low %v237_v3, %v238_v4  ;;  %v1637_v7 = vld [vmem:[%s225_s8 + $0xc] sm:$0xf]  ;;  %v317_v8 = vld [vmem:[%s1630_s11] sm:$0xf]  ;;  %v1131_v9 = vld [vmem:[%s1630_s11 + $0x4] sm:$0xf] }
  0x19   : > { %v1119_v10 = vcombine.low %v1625_v5, %v1637_v7  ;;  %v342_v11 = vsel %vm259_vm0, %v317_v8, 0  ;;  %v511_v12 = vsel %vm259_vm0, %v1131_v9, 0  ;;  %v1421_v24 = vld [vmem:[%s1635_s14 + $0x38] sm:$0xff]   ;;  %v1422_v27 = vld [vmem:[%s1635_s14 + $0x30] sm:$0xff]   ;;  %v1424_v29 = vld [vmem:[%s1635_s14 + $0x28] sm:$0xff]   ;;  %s1111_s29 = sshll.u32 %s218_s28, 2 }
  0x1a   : > { %1265 = vmatprep.mubr.msk.bf16.mxu0 %vm252_vm2, %v1118_v6  ;;  %1270 = vmatpush3.bf16.msra.mxu1 %v342_v11  ;;  %v1423_v25 = vld [vmem:[%s1635_s14 + $0x78] sm:$0xff]   ;;  %v1425_v28 = vld [vmem:[%s1635_s14 + $0x70] sm:$0xff]   ;;  %v1426_v39 = vld [vmem:[%s1635_s14 + $0x20] sm:$0xff]   ;;  %s1210_s30 = sshll.u32 %s1584_s19, 6  ;;  %s220_s5 = scalar_lea.vmem [#allocation3], %s1111_s29 }
  0x1b   : > { %1266 = vmatmul.mubr.msk.bf16.vlgmr.msra.gmra.mxu0 %vm252_vm2, %v1119_v10  ;;  %1295 = vmatprep.subr.bf16.mxu1 %v1531_v2  ;;  %v1427_v40 = vld [vmem:[%s1635_s14 + $0x68] sm:$0xff]   ;;  %v1428_v41 = vld [vmem:[%s1635_s14 + $0x18] sm:$0xff]   ;;  %v1429_v42 = vld [vmem:[%s1635_s14 + $0x60] sm:$0xff]   ;;  %s1024_s6 = sshll.u32 %s220_s5, 4  ;;  %s1022_s9 = scalar_lea.hbm %s1809_s4, %s1210_s30  ;;  %s1025_s6 = int_to_ptr.vmem [resolvable:$true] %s1024_s6 }
  0x1c   : > { %1291 = vmatprep.mubr.msk.bf16.mxu0 %vm1532_vm1, %v1531_v2  ;;  %1276 = vmatpush3.bf16.msra.mxu0 %v1421_v24  ;;  %v1430_v43 = vld [vmem:[%s1635_s14 + $0x10] sm:$0xff]   ;;  %v1431_v44 = vld [vmem:[%s1635_s14 + $0x58] sm:$0xff]   ;;  %v1432_v45 = vld [vmem:[%s1635_s14 + $0x8] sm:$0xff]   ;;  %s1475_s19 = scalar_lea.vmem %s1474_s13, 128  ;;  %p1476_p0 = scmp.lt.s32.totalorder %s1025_s6, %s1474_s13 }
  0x1d   : > { %1272 = vmatmul.mubr.msk.bf16.vlgmr.msra.gmra.mxu1 %vm252_vm2, %v237_v3  ;;  %1277 = vmatprep.subr.bf16.mxu0 %v1531_v2  ;;  %v1433_v46 = vld [vmem:[%s1635_s14 + $0x50] sm:$0xff]   ;;  %v1434_v47 = vld [vmem:[%s1635_s14] sm:$0xff]   ;;  %v1435_v48 = vld [vmem:[%s1635_s14 + $0x48] sm:$0xff]  }
  0x1e   : > { %1296 = vmatpush3.bf16.msra.mxu1 %v511_v12  ;;  %1297 = vmatprep.mubr.msk.bf16.mxu1 %vm1532_vm1, %v1531_v2  ;;  %v1436_v49 = vld [vmem:[%s1635_s14 + $0x40] sm:$0xff]   ;;  %v1157_v56 = vld [vmem:[%s1630_s11 + $0x8] sm:$0xf]  ;;  %v1183_v60 = vld [vmem:[%s1630_s11 + $0xc] sm:$0xf]  ;;  %s1469_s11 = scalar_lea.vmem %s1025_s6, 64 }
  0x1f   : > { %1301 = vmatprep.subr.bf16.mxu1 %v1531_v2  ;;  %v685_v59 = vsel %vm259_vm0, %v1157_v56, 0  ;;  %v859_v63 = vsel %vm259_vm0, %v1183_v60, 0  ;;  %v1437_v0 = vld [vmem:[%s1635_s14 + $0xb8] sm:$0xff]   ;;  %v1438_v3 = vld [vmem:[%s1635_s14 + $0xb0] sm:$0xff]   ;;  %v1445_v31 = vld [vmem:[%s1635_s14 + $0xe0] sm:$0xff]   ;;  %p1470_p11 = scmp.ne.s32.totalorder %s1025_s6, %s1469_s11  ;;  %p1477_p1 = scmp.lt.s32.totalorder %s1475_s19, %s1469_s11 }
  0x20   : > { %1278 = vmatpush3.bf16.msra.mxu0 %v1422_v27  ;;  %v1439_v1 = vld [vmem:[%s1635_s14 + $0xf8] sm:$0xff]   ;;  %v1446_v32 = vld [vmem:[%s1635_s14 + $0x90] sm:$0xff]  }
  0x21   : > { %1279 = vmatprep.subr.bf16.mxu0 %v1531_v2  ;;  %v1444_v30 = vld [vmem:[%s1635_s14 + $0x98] sm:$0xff]   ;;  %p1471_p12 = pnand %p1470_p11, %p1601_p5  ;;  %p1478_p2 = por %p1477_p1, %p1476_p0 }
  0x23   : > { %p1472_p13 = pneg %p1471_p12 }
  0x24   : > { %1280 = vmatpush3.bf16.msra.mxu0 %v1424_v29  ;;  %v1443_v29 = vld [vmem:[%s1635_s14 + $0xe8] sm:$0xff]  }
  0x25   : > { %1298 = vmatmul.mubr.msk.bf16.vlgmr.msra.gmra.mxu1 %vm252_vm2, %v238_v4  ;;  %1281 = vmatprep.subr.bf16.mxu0 %v1531_v2  ;;  %v1441_v4 = vld [vmem:[%s1635_s14 + $0xf0] sm:$0xff]   ;;  %p1479_p3 = pnand %p1478_p2, %p1472_p13 }
  0x26   : > { %1317 = vmatprep.mubr.msk.bf16.mxu1 %vm1532_vm1, %v1531_v2  ;;  %1302 = vmatpush3.bf16.msra.mxu1 %v1423_v25 }
  0x27   : > { %1303 = vmatprep.subr.bf16.mxu1 %v1531_v2 }
  0x28   : > { %1282 = vmatpush3.bf16.msra.mxu0 %v1426_v39 }
  0x29   : > { %1283 = vmatprep.subr.bf16.mxu0 %v1531_v2 }
  0x2a   : > { %1304 = vmatpush3.bf16.msra.mxu1 %v1425_v28  ;;  %v1442_v28 = vld [vmem:[%s1635_s14 + $0xa0] sm:$0xff]  }
  0x2b   : > { %1305 = vmatprep.subr.bf16.mxu1 %v1531_v2 }
  0x2c   : > { %1284 = vmatpush3.bf16.msra.mxu0 %v1428_v41 }
  0x2d   : > { %1285 = vmatprep.subr.bf16.mxu0 %v1531_v2 }
  0x2e   : > { %1306 = vmatpush3.bf16.msra.mxu1 %v1427_v40 }
  0x2f   : > { %1307 = vmatprep.subr.bf16.mxu1 %v1531_v2 }
  0x30   : > { %1286 = vmatpush3.bf16.msra.mxu0 %v1430_v43 }
  0x31   : > { %1287 = vmatprep.subr.bf16.mxu0 %v1531_v2 }
  0x32   : > { %1308 = vmatpush3.bf16.msra.mxu1 %v1429_v42 }
  0x33   : > { %1309 = vmatprep.subr.bf16.mxu1 %v1531_v2 }
  0x34   : > { %1288 = vmatpush3.bf16.msra.mxu0 %v1432_v45 }
  0x35   : > { %1289 = vmatprep.subr.bf16.mxu0 %v1531_v2 }
  0x36   : > { %1310 = vmatpush3.bf16.msra.mxu1 %v1431_v44 }
  0x37   : > { %1311 = vmatprep.subr.bf16.mxu1 %v1531_v2 }
  0x38   : > { %1290 = vmatpush3.bf16.msra.mxu0 %v1434_v47 }
  0x39   : > { %1321 = vmatprep.subr.bf16.mxu0 %v1531_v2 }
  0x3a   : > { %1312 = vmatpush3.bf16.msra.mxu1 %v1433_v46 }
  0x3b   : > { %1313 = vmatprep.subr.bf16.mxu1 %v1531_v2 }
  0x3e   : > { %1314 = vmatpush3.bf16.msra.mxu1 %v1435_v48 }
  0x3f   : > { %1315 = vmatprep.subr.bf16.mxu1 %v1531_v2 }
  0x42   : > { %1316 = vmatpush3.bf16.msra.mxu1 %v1436_v49 }
  0x43   : > { %1347 = vmatprep.subr.bf16.mxu1 %v1531_v2 }
  0xdb   : > { %v1267_v13 = vpop.f32.mrf.mxu0 }
  0xdd   : > { %v297_v14 = vpop.f32.mrf.mxu0  ;;  %v378_v15 = vpop.f32.mrf.mxu1 }
  0xde   : > { %336 = vrot.lane.b32.xlu0 %v297_v14, %s1533_s20 }
  0xdf   : > { %v1268_v16 = vpop.f32.mrf.mxu0  ;;  %v1273_v17 = vpop.f32.mrf.mxu1 }
  0xe1   : > { %v300_v18 = vpop.f32.mrf.mxu0  ;;  %v381_v19 = vpop.f32.mrf.mxu1 }
  0xe2   : > { %505 = vrot.lane.b32.xlu0 %v300_v18, %s1533_s20 }
  0xe3   : > { %v1274_v20 = vpop.f32.mrf.mxu1 }
  0xe5   : > { %v547_v21 = vpop.f32.mrf.mxu1 }
  0xe6   : > { %679 = vrot.lane.b32.xlu0 %v1267_v13, %s1533_s20 }
  0xe7   : > { %v1299_v22 = vpop.f32.mrf.mxu1 }
  0xe9   : > { %v550_v23 = vpop.f32.mrf.mxu1 }
  0xeb   : > { %v1300_v26 = vpop.f32.mrf.mxu1 }
 0x150   : > { %v337_v33 = vpop.permute.xlu0 %336 }
 0x151   : > { %v379_v34 = vadd.f32 %v378_v15, %v337_v33  ;;  %v1447_v33 = vld [vmem:[%s1635_s14 + $0xd8] sm:$0xff]  }
 0x153   : > { %v384_v35 = vsel %vm316_vm3, -inf, %v379_v34  ;;  %v1448_v34 = vld [vmem:[%s1635_s14 + $0x88] sm:$0xff]  }
 0x154   : > { %385 = vmax.xlane.f32.xlu1 %v384_v35  ;;  %v506_v36 = vpop.permute.xlu0 %505 }
 0x155   : > { %v548_v37 = vadd.f32 %v547_v21, %v506_v36  ;;  %v1450_v36 = vld [vmem:[%s1635_s14 + $0x80] sm:$0xff]  }
 0x157   : > { %v553_v38 = vsel %vm316_vm3, -inf, %v548_v37  ;;  %v1451_v37 = vld [vmem:[%s1635_s14 + $0xc8] sm:$0xff]  }
 0x158   : > { %554 = vmax.xlane.f32.xlu1 %v553_v38  ;;  %v680_v12 = vpop.permute.xlu0 %679 }
 0x169   : > { %853 = vrot.lane.b32.xlu1 %v1268_v16, %s1533_s20 }
 0x1dd   : > { %v386_v50 = vpop.xlane.xlu1 %385 }
 0x1de   : > { %v387_v51 = vsub.f32 %v384_v35, %v386_v50  ;;  %v1449_v35 = vld [vmem:[%s1635_s14 + $0xd0] sm:$0xff]  }
 0x1e0   : > { %v388_v52 = vmul.f32 1.442695, %v387_v51 }
 0x1e1   : > { %v555_v53 = vpop.xlane.xlu1 %554 }
 0x1e2   : > { %1453 = vpow2.f32 %v388_v52  ;;  %v556_v54 = vsub.f32 %v553_v38, %v555_v53  ;;  %v1452_v38 = vld [vmem:[%s1635_s14 + $0xc0] sm:$0xff]  }
 0x1e4   : > { %v557_v55 = vmul.f32 1.442695, %v556_v54 }
 0x1e5   : > { %v854_v18 = vpop.permute.xlu1 %853 }
 0x1e6   : > { %1455 = vpow2.f32 %v557_v55 }
 0x1ef   : > { %v1706_v57 = vpop.eup %1453 }
 0x1f0   : > { %v392_v58 = vpack.c.bf16 %v1706_v57, %v1706_v57 }
 0x1f2   : > { %1292 = vmatmul.mubr.bf16.vlgmr.msra.gmra.mxu0 %v392_v58 }
 0x1f3   : > { %v1456_v61 = vpop.eup %1455  ;;  %1322 = vmatpush3.bf16.msra.mxu0 %v685_v59  ;;  %1323 = vmatprep.mubr.msk.bf16.mxu0 %vm1532_vm1, %v1531_v2 }
 0x1f4   : > { %v561_v62 = vpack.c.bf16 %v1456_v61, %v1456_v61  ;;  %1327 = vmatprep.subr.bf16.mxu0 %v1531_v2 }
 0x1f6   : > { %1318 = vmatmul.mubr.bf16.vlgmr.msra.gmra.mxu1 %v561_v62 }
 0x1f7   : > { %1348 = vmatpush3.bf16.msra.mxu1 %v859_v63  ;;  %1349 = vmatprep.mubr.msk.bf16.mxu1 %vm1532_vm1, %v1531_v2 }
 0x1f8   : > { %1353 = vmatprep.subr.bf16.mxu1 %v1531_v2 }
 0x1fa   : > { %1324 = vmatmul.mubr.msk.bf16.vlgmr.msra.gmra.mxu0 %vm252_vm2, %v1625_v5  ;;  %v1440_v5 = vld [vmem:[%s1635_s14 + $0xa8] sm:$0xff]  }
 0x1fb   : > { %1343 = vmatprep.mubr.msk.bf16.mxu0 %vm1532_vm1, %v1531_v2  ;;  %1328 = vmatpush3.bf16.msra.mxu0 %v1437_v0 }
 0x1fc   : > { %1329 = vmatprep.subr.bf16.mxu0 %v1531_v2 }
 0x1fe   : > { %1350 = vmatmul.mubr.msk.bf16.vlgmr.msra.gmra.mxu1 %vm252_vm2, %v1637_v7 }
 0x1ff   : > { %1369 = vmatprep.mubr.msk.bf16.mxu1 %vm1532_vm1, %v1531_v2  ;;  %1354 = vmatpush3.bf16.msra.mxu1 %v1439_v1 }
 0x200   : > { %1355 = vmatprep.subr.bf16.mxu1 %v1531_v2  ;;  %1330 = vmatpush3.bf16.msra.mxu0 %v1438_v3 }
 0x201   : > { %1331 = vmatprep.subr.bf16.mxu0 %v1531_v2 }
 0x203   : > { %1356 = vmatpush3.bf16.msra.mxu1 %v1441_v4 }
 0x204   : > { %1357 = vmatprep.subr.bf16.mxu1 %v1531_v2  ;;  %1332 = vmatpush3.bf16.msra.mxu0 %v1440_v5 }
 0x205   : > { %1333 = vmatprep.subr.bf16.mxu0 %v1531_v2 }
 0x207   : > { %1358 = vmatpush3.bf16.msra.mxu1 %v1443_v29 }
 0x208   : > { %1334 = vmatpush3.bf16.msra.mxu0 %v1442_v28  ;;  %1359 = vmatprep.subr.bf16.mxu1 %v1531_v2 }
 0x209   : > { %1335 = vmatprep.subr.bf16.mxu0 %v1531_v2 }
 0x20b   : > { %1360 = vmatpush3.bf16.msra.mxu1 %v1445_v31 }
 0x20c   : > { %1336 = vmatpush3.bf16.msra.mxu0 %v1444_v30  ;;  %1361 = vmatprep.subr.bf16.mxu1 %v1531_v2 }
 0x20d   : > { %1337 = vmatprep.subr.bf16.mxu0 %v1531_v2 }
 0x20f   : > { %1362 = vmatpush3.bf16.msra.mxu1 %v1447_v33 }
 0x210   : > { %1338 = vmatpush3.bf16.msra.mxu0 %v1446_v32  ;;  %1363 = vmatprep.subr.bf16.mxu1 %v1531_v2 }
 0x211   : > { %1339 = vmatprep.subr.bf16.mxu0 %v1531_v2 }
 0x213   : > { %1364 = vmatpush3.bf16.msra.mxu1 %v1449_v35 }
 0x214   : > { %1340 = vmatpush3.bf16.msra.mxu0 %v1448_v34  ;;  %1365 = vmatprep.subr.bf16.mxu1 %v1531_v2 }
 0x215   : > { %1341 = vmatprep.subr.bf16.mxu0 %v1531_v2 }
 0x217   : > { %1366 = vmatpush3.bf16.msra.mxu1 %v1451_v37 }
 0x218   : > { %1342 = vmatpush3.bf16.msra.mxu0 %v1450_v36  ;;  %1367 = vmatprep.subr.bf16.mxu1 %v1531_v2 }
 0x21b   : > { %1368 = vmatpush3.bf16.msra.mxu1 %v1452_v38 }
 0x2b2   : > { %v1737_v6 = vpop.f32.mrf.mxu0 }
 0x2b4   : > { %v1293_v7 = vpop.f32.mrf.mxu0 }
 0x2b6   : > { %v478_v8 = vpop.f32.mrf.mxu0  ;;  %v1739_v9 = vpop.f32.mrf.mxu1 }
 0x2b8   : > { %v1294_v10 = vpop.f32.mrf.mxu0  ;;  %v1319_v11 = vpop.f32.mrf.mxu1 }
 0x2ba   : > { %v647_v13 = vpop.f32.mrf.mxu1  ;;  %v721_v14 = vpop.f32.mrf.mxu0 }
 0x2bb   : > { %v722_v15 = vadd.f32 %v721_v14, %v680_v12 }
 0x2bc   : > { %v1320_v16 = vpop.f32.mrf.mxu1  ;;  %v1325_v17 = vpop.f32.mrf.mxu0 }
 0x2bd   : > { %v727_v19 = vsel %vm316_vm3, -inf, %v722_v15 }
 0x2be   : > { %v895_v20 = vpop.f32.mrf.mxu1  ;;  %728 = vmax.xlane.f32.xlu0 %v727_v19  ;;  %v724_v21 = vpop.f32.mrf.mxu0 }
 0x2bf   : > { %v896_v22 = vadd.f32 %v895_v20, %v854_v18 }
 0x2c0   : > { %v1326_v23 = vpop.f32.mrf.mxu0  ;;  %v1351_v24 = vpop.f32.mrf.mxu1 }
 0x2c1   : > { %v901_v25 = vsel %vm316_vm3, -inf, %v896_v22 }
 0x2c2   : > { %v898_v26 = vpop.f32.mrf.mxu1  ;;  %902 = vmax.xlane.f32.xlu1 %v901_v25  ;;  %559 = vadd.xlane.f32.xlu0 %v1456_v61 }
 0x2c4   : > { %v1352_v27 = vpop.f32.mrf.mxu1 }
 0x347   : > { %v729_v39 = vpop.xlane.xlu0 %728 }
 0x348   : > { %v730_v40 = vsub.f32 %v727_v19, %v729_v39 }
 0x34a   : > { %v731_v41 = vmul.f32 1.442695, %v730_v40 }
 0x34b   : > { %v903_v42 = vpop.xlane.xlu1 %902  ;;  %v560_v2 = vpop.xlane.xlu0 %559 }
 0x34c   : > { %1457 = vpow2.f32 %v731_v41  ;;  %v904_v43 = vsub.f32 %v901_v25, %v903_v42 }
 0x34e   : > { %v905_v44 = vmul.f32 1.442695, %v904_v43 }
 0x350   : > { %1459 = vpow2.f32 %v905_v44 }
 0x351   : > { %1461 = vrcp.f32 %v560_v2 }
 0x359   : > { %v1458_v45 = vpop.eup %1457 }
 0x35a   : > { %733 = vadd.xlane.f32.xlu0 %v1458_v45  ;;  %v735_v46 = vpack.c.bf16 %v1458_v45, %v1458_v45 }
 0x35c   : > { %1344 = vmatmul.mubr.bf16.vlgmr.msra.gmra.mxu0 %v735_v46 }
 0x35d   : > { %v1460_v47 = vpop.eup %1459 }
 0x35e   : > { %907 = vadd.xlane.f32.xlu0 %v1460_v47  ;;  %v909_v48 = vpack.c.bf16 %v1460_v47, %v1460_v47  ;;  %v1462_v49 = vpop.eup %1461 }
 0x35f   : > { %v651_v50 = vmul.f32 %v1462_v49, %v1739_v9 }
 0x360   : > { %1370 = vmatmul.mubr.bf16.vlgmr.msra.gmra.mxu1 %v909_v48 }
 0x362   : > { %390 = vadd.xlane.f32.xlu0 %v1706_v57 }
 0x378   : > { %653 = vrot.lane.b32.xlu0 %v651_v50, %s1534_s22 }
 0x3e3   : > { %v734_v51 = vpop.xlane.xlu0 %733 }
 0x3e7   : > { %v908_v52 = vpop.xlane.xlu0 %907 }
 0x3eb   : > { %v391_v53 = vpop.xlane.xlu0 %390 }
 0x3ec   : > { %1463 = vrcp.f32 %v391_v53 }
 0x3ed   : > { %1465 = vrcp.f32 %v734_v51 }
 0x3ee   : > { %1467 = vrcp.f32 %v908_v52 }
 0x3ef   : > { %v654_v56 = vpop.permute.xlu0 %653 }
 0x3f9   : > { %v1464_v54 = vpop.eup %1463 }
 0x3fa   : > { %v482_v55 = vmul.f32 %v1464_v54, %v1737_v6  ;;  %v1466_v57 = vpop.eup %1465 }
 0x3fb   : > { %v1468_v61 = vpop.eup %1467 }
 0x3fc   : > { %483 = vst.msk [vmem:[#allocation2] sm:$0xff] %vm252_vm2, %v482_v55 }
 0x3fd   : > { %657 = vst.msk [vmem:[#allocation2] sm:$0xff] %vm656_vm4, %v654_v56 }
 0x41c   : > { %v818_v58 = vpop.f32.mrf.mxu0 }
 0x41d   : > { %v825_v59 = vmul.f32 %v1466_v57, %v818_v58 }
 0x41e   : > { %v1345_v60 = vpop.f32.mrf.mxu0 }
 0x41f   : > { %827 = vrot.lane.b32.xlu1 %v825_v59, %s1535_s23 }
 0x420   : > { %v821_v62 = vpop.f32.mrf.mxu0  ;;  %v992_v63 = vpop.f32.mrf.mxu1 }
 0x421   : > { %v999_v0 = vmul.f32 %v1468_v61, %v992_v63 }
 0x422   : > { %v1346_v1 = vpop.f32.mrf.mxu0  ;;  %v1371_v3 = vpop.f32.mrf.mxu1 }
 0x423   : > { %1001 = vrot.lane.b32.xlu1 %v999_v0, %s1536_s27 }
 0x424   : > { %v995_v4 = vpop.f32.mrf.mxu1 }
 0x426   : > { %v1372_v5 = vpop.f32.mrf.mxu1 }
 0x491   : > { %v828_v6 = vpop.permute.xlu1 %827 }
 0x492   : > { %831 = vst.msk [vmem:[#allocation2] sm:$0xff] %vm830_vm5, %v828_v6 }
 0x495   : > { %v1002_v7 = vpop.permute.xlu1 %1001 }
 0x496   : > { %1005 = vst.msk [vmem:[#allocation2] sm:$0xff] %vm1004_vm6, %v1002_v7 }
 0x49d   : > { %v1006_v8 = vld [vmem:[#allocation2] sm:$0xff] }
 0x49e   : > { %v1007_v9 = vpack.c.bf16 %v1006_v8, %v1006_v8 }
 0x4a0   : > { %1009 = vst.msk [vmem:[%s220_s5] sm:$0xf] %vm1008_vm7, %v1007_v9 }
 0x4a1   : > { %1482 = shalt.err (!%p1479_p3)
}
 0x4a2   : > { %s1483_s14 = scalar_lea.hbm %s1022_s9, 64  ;;  %s1487_s23 = scalar_lea.hbm %s1809_s4, 128 }
 0x4a3   : > { %p1484_p4 = scmp.ne.s32.totalorder %s1022_s9, %s1483_s14  ;;  %p1488_p9 = scmp.lt.s32.totalorder %s1022_s9, %s1809_s4 }
 0x4a4   : > { %p1489_p10 = scmp.lt.s32.totalorder %s1487_s23, %s1483_s14 }
 0x4a5   : > { %p1485_p7 = pnand %p1484_p4, %p1601_p5 }
 0x4a6   : > { %p1490_p11 = por %p1489_p10, %p1488_p9 }
 0x4a7   : > { %p1486_p8 = pneg %p1485_p7 }
 0x4a9   : > { %p1491_p12 = pnand %p1490_p11, %p1486_p8 }
 0x4ab   : > { %1494 = shalt.err (!%p1491_p12)
}
 0x4ac   : > { %1374 = dma.vmem_to_hbm [thread:$0]  (%p1601_p5), %s1025_s6, 64, %s1022_s9, %s1011_s10  }
 0x4ad PF: > { %p1380_p13 = scmp.ge.s32.totalorder %s1529_s18, 2  ;;  %s1036_s29 = sand.u32 1, %s1517_s15  }
 0x4ae   : > { %s1037_s30 = scalar_lea.sflag [#allocation4], %s1036_s29 }
 0x4af   : > { %p1377_p0 = pnand %p1380_p13, %p1605_p6 }
 0x4b1   : > { %p1378_p1 = pneg %p1377_p0 }
 0x4b3   : > { %1512 = dma.done.wait (%p1378_p1), %s1037_s30, 64  }
 0x4b4   : > { %1514 = vsyncadd (%p1378_p1), %s1037_s30, 4294967232  ;;  %p14_p2 = scmp.ge.s32.totalorder %s1588_s21, 4   ;;  %s1812_s15 = smov %s1521_s16 }
 0x4b5   : > { %s1813_s16 = smov %s1525_s17  ;;  %s1814_s17 = smov %s1599_s24 }
 0x4b6   : > { %s1815_s18 = smov %s1588_s21  ;;  %16 = sbr.rel (!%p14_p2) target bundleno = 3 (0x3), region = 83 }
 0x4bb   :  { %1042 = vsyncpa [#allocation4], 1 }
 0x4bc   :  { %1044 = vsyncpa [#allocation4 + $0x1], 1 }

</bundles_post_ra>
